<compile_context>
chip_gen: v7x
topology: tpu7x:2x2x1
jax: 0.10.0
libtpu: 0.0.40
codegen_flags: <defaults>
</compile_context>

<pallas_src>
import jax
import jax.numpy as jnp
from jax.experimental import pallas as pl
from jax.experimental.pallas import tpu as pltpu

S = 7
D = S * S        # 49 logical features
DP = 128         # padded (lane-dense) feature dim


def _round_up(n, m):
    return ((n + m - 1) // m) * m


def mlp_kernel(x_ref, w1_ref, b1_ref, w2_ref, b2_ref, w3_ref, b3_ref, o_ref):
    x = x_ref[...]
    # fc1 + ReLU
    h = jnp.dot(x, w1_ref[...], preferred_element_type=jnp.float32) + b1_ref[...]
    h = jnp.maximum(h, 0.0)
    # fc2 + ReLU
    h = jnp.dot(h.astype(w2_ref.dtype), w2_ref[...],
                preferred_element_type=jnp.float32) + b2_ref[...]
    h = jnp.maximum(h, 0.0)
    # fc3 + sigmoid (tanh form -> EUP slot, exact to f32 rounding)
    z = jnp.dot(h.astype(w3_ref.dtype), w3_ref[...],
                preferred_element_type=jnp.float32) + b3_ref[...]
    o_ref[...] = (0.5 * (jnp.tanh(0.5 * z) + 1.0)).astype(o_ref.dtype)


def net_forward(x, params, *, tb=512):
    """x: (B, 49) float32. params: padded (128,128)/(1,128) weights & biases.

    Returns (B, 49) float32.
    """
    B = x.shape[0]
    assert x.shape[1] == D

    # Pad features to a lane-dense 128 and batch to a sublane-aligned tile.
    TB = min(tb, _round_up(B, 8))
    Bp = _round_up(B, TB)
    xp = jnp.zeros((Bp, DP), x.dtype).at[:B, :D].set(x)

    grid = (Bp // TB,)
    io_spec = pl.BlockSpec((TB, DP), lambda i: (i, 0))
    w_spec = pl.BlockSpec((DP, DP), lambda i: (0, 0))   # resident across grid steps
    b_spec = pl.BlockSpec((1, DP), lambda i: (0, 0))    # resident across grid steps

    out = pl.pallas_call(
        mlp_kernel,
        out_shape=jax.ShapeDtypeStruct((Bp, DP), jnp.float32),
        grid_spec=pltpu.PrefetchScalarGridSpec(
            num_scalar_prefetch=0,
            grid=grid,
            in_specs=[io_spec, w_spec, b_spec, w_spec, b_spec, w_spec, b_spec],
            out_specs=io_spec,
        ),
        compiler_params=pltpu.CompilerParams(
            dimension_semantics=("parallel",),
        ),
    )(
        xp,
        params["w1"], params["b1"],
        params["w2"], params["b2"],
        params["w3"], params["b3"],
    )
    return out[:B, :D]


def init_params(key, compute_dtype=jnp.float32):
    """PyTorch Linear default init U(-1/sqrt(in), 1/sqrt(in)), stored as (in, out)
    and zero-padded to (128, 128) / (1, 128) so padded lanes contribute exactly 0."""
    bound = 1.0 / jnp.sqrt(jnp.float32(D))
    keys = jax.random.split(key, 6)

    def u(k, shape):
        return jax.random.uniform(k, shape, jnp.float32, -bound, bound)

    def pad_w(w):
        return jnp.zeros((DP, DP), jnp.float32).at[:D, :D].set(w).astype(compute_dtype)

    def pad_b(b):
        return jnp.zeros((1, DP), jnp.float32).at[:, :D].set(b).astype(compute_dtype)

    return {
        "w1": pad_w(u(keys[0], (D, D))), "b1": pad_b(u(keys[1], (1, D))),
        "w2": pad_w(u(keys[2], (D, D))), "b2": pad_b(u(keys[3], (1, D))),
        "w3": pad_w(u(keys[4], (D, D))), "b3": pad_b(u(keys[5], (1, D))),
    }


def reference_forward(x, p):
    """Pure-JAX reference on the unpadded (49x49) slices of the padded params."""
    w1, b1 = p["w1"][:D, :D].astype(jnp.float32), p["b1"][:, :D].astype(jnp.float32)
    w2, b2 = p["w2"][:D, :D].astype(jnp.float32), p["b2"][:, :D].astype(jnp.float32)
    w3, b3 = p["w3"][:D, :D].astype(jnp.float32), p["b3"][:, :D].astype(jnp.float32)
    h = jnp.maximum(x @ w1 + b1, 0.0)
    h = jnp.maximum(h @ w2 + b2, 0.0)
    z = h @ w3 + b3
    return jax.nn.sigmoid(z)


if __name__ == "__main__":
    key = jax.random.PRNGKey(0)
    k_param, k_x = jax.random.split(key)
    params = init_params(k_param)

    B = 8
    x = jax.random.normal(k_x, (B, D), jnp.float32)

    out = net_forward(x, params)
    out = jax.block_until_ready(out)

    ref = reference_forward(x, params)
    assert out.shape == (B, D), out.shape
    assert jnp.allclose(out, ref, atol=1e-5, rtol=1e-5), "mismatch vs reference"
    print("KERNEL_OK")
</pallas_src>

<mosaic_0001>
module attributes {stable_mosaic.version = 11 : i64} {
  func.func @mlp_kernel(%arg0: i32, %arg1: memref<8x128xf32, #tpu.memory_space<vmem>>, %arg2: memref<128x128xf32, #tpu.memory_space<vmem>>, %arg3: memref<1x128xf32, #tpu.memory_space<vmem>>, %arg4: memref<128x128xf32, #tpu.memory_space<vmem>>, %arg5: memref<1x128xf32, #tpu.memory_space<vmem>>, %arg6: memref<128x128xf32, #tpu.memory_space<vmem>>, %arg7: memref<1x128xf32, #tpu.memory_space<vmem>>, %arg8: memref<8x128xf32, #tpu.memory_space<vmem>>) attributes {dimension_semantics = [#tpu.dimension_semantics<parallel>], iteration_bounds = array<i64: 1>, scalar_prefetch = 0 : i64, scratch_operands = 0 : i64, tpu.core_type = #tpu.core_type<tc>, window_params = [{transform_indices = @transform_0, window_bounds = array<i64: 8, 128>}, {pipeline_mode = #tpu.pipeline_mode<synchronous>, transform_indices = @transform_1, window_bounds = array<i64: 128, 128>}, {pipeline_mode = #tpu.pipeline_mode<synchronous>, transform_indices = @transform_2, window_bounds = array<i64: 1, 128>}, {pipeline_mode = #tpu.pipeline_mode<synchronous>, transform_indices = @transform_3, window_bounds = array<i64: 128, 128>}, {pipeline_mode = #tpu.pipeline_mode<synchronous>, transform_indices = @transform_4, window_bounds = array<i64: 1, 128>}, {pipeline_mode = #tpu.pipeline_mode<synchronous>, transform_indices = @transform_5, window_bounds = array<i64: 128, 128>}, {pipeline_mode = #tpu.pipeline_mode<synchronous>, transform_indices = @transform_6, window_bounds = array<i64: 1, 128>}, {transform_indices = @transform_7, window_bounds = array<i64: 8, 128>}]} {
    %c0 = arith.constant 0 : index
    %c0_0 = arith.constant 0 : index
    %0 = vector.load %arg1[%c0, %c0_0] : memref<8x128xf32, #tpu.memory_space<vmem>>, vector<8x128xf32>
    %c0_1 = arith.constant 0 : index
    %c0_2 = arith.constant 0 : index
    %1 = vector.load %arg2[%c0_1, %c0_2] : memref<128x128xf32, #tpu.memory_space<vmem>>, vector<128x128xf32>
    %cst = arith.constant dense<0.000000e+00> : vector<8x128xf32>
    %2 = tpu.matmul %0, %1, %cst {dimension_numbers = #tpu.dot_dimension_numbers<[1], [0], [0], [1], [0, 0, 1, 1], [], []>} : vector<8x128xf32>, vector<128x128xf32>, vector<8x128xf32> -> vector<8x128xf32>
    %c0_3 = arith.constant 0 : index
    %c0_4 = arith.constant 0 : index
    %3 = vector.load %arg3[%c0_3, %c0_4] : memref<1x128xf32, #tpu.memory_space<vmem>>, vector<1x128xf32>
    %4 = vector.broadcast %3 : vector<1x128xf32> to vector<8x128xf32>
    %5 = arith.addf %2, %4 : vector<8x128xf32>
    %cst_5 = arith.constant 0.000000e+00 : f32
    %6 = vector.broadcast %cst_5 : f32 to vector<8x128xf32>
    %7 = arith.maximumf %5, %6 : vector<8x128xf32>
    %c0_6 = arith.constant 0 : index
    %c0_7 = arith.constant 0 : index
    %8 = vector.load %arg4[%c0_6, %c0_7] : memref<128x128xf32, #tpu.memory_space<vmem>>, vector<128x128xf32>
    %cst_8 = arith.constant dense<0.000000e+00> : vector<8x128xf32>
    %9 = tpu.matmul %7, %8, %cst_8 {dimension_numbers = #tpu.dot_dimension_numbers<[1], [0], [0], [1], [0, 0, 1, 1], [], []>} : vector<8x128xf32>, vector<128x128xf32>, vector<8x128xf32> -> vector<8x128xf32>
    %c0_9 = arith.constant 0 : index
    %c0_10 = arith.constant 0 : index
    %10 = vector.load %arg5[%c0_9, %c0_10] : memref<1x128xf32, #tpu.memory_space<vmem>>, vector<1x128xf32>
    %11 = vector.broadcast %10 : vector<1x128xf32> to vector<8x128xf32>
    %12 = arith.addf %9, %11 : vector<8x128xf32>
    %cst_11 = arith.constant 0.000000e+00 : f32
    %13 = vector.broadcast %cst_11 : f32 to vector<8x128xf32>
    %14 = arith.maximumf %12, %13 : vector<8x128xf32>
    %c0_12 = arith.constant 0 : index
    %c0_13 = arith.constant 0 : index
    %15 = vector.load %arg6[%c0_12, %c0_13] : memref<128x128xf32, #tpu.memory_space<vmem>>, vector<128x128xf32>
    %cst_14 = arith.constant dense<0.000000e+00> : vector<8x128xf32>
    %16 = tpu.matmul %14, %15, %cst_14 {dimension_numbers = #tpu.dot_dimension_numbers<[1], [0], [0], [1], [0, 0, 1, 1], [], []>} : vector<8x128xf32>, vector<128x128xf32>, vector<8x128xf32> -> vector<8x128xf32>
    %c0_15 = arith.constant 0 : index
    %c0_16 = arith.constant 0 : index
    %17 = vector.load %arg7[%c0_15, %c0_16] : memref<1x128xf32, #tpu.memory_space<vmem>>, vector<1x128xf32>
    %18 = vector.broadcast %17 : vector<1x128xf32> to vector<8x128xf32>
    %19 = arith.addf %16, %18 : vector<8x128xf32>
    %cst_17 = arith.constant 5.000000e-01 : f32
    %20 = vector.broadcast %cst_17 : f32 to vector<8x128xf32>
    %21 = arith.mulf %20, %19 : vector<8x128xf32>
    %22 = math.tanh %21 : vector<8x128xf32>
    %cst_18 = arith.constant 1.000000e+00 : f32
    %23 = vector.broadcast %cst_18 : f32 to vector<8x128xf32>
    %24 = arith.addf %22, %23 : vector<8x128xf32>
    %cst_19 = arith.constant 5.000000e-01 : f32
    %25 = vector.broadcast %cst_19 : f32 to vector<8x128xf32>
    %26 = arith.mulf %25, %24 : vector<8x128xf32>
    %c0_20 = arith.constant 0 : index
    %c0_21 = arith.constant 0 : index
    %27 = vector.load %arg8[%c0_20, %c0_21] : memref<8x128xf32, #tpu.memory_space<vmem>>, vector<8x128xf32>
    tpu.vector_store %arg8[%c0_20, %c0_21], %26 {strides = array<i32>} : memref<8x128xf32, #tpu.memory_space<vmem>>, vector<8x128xf32>,
    return
  }
  func.func @transform_0(%arg0: i32) -> (i32, i32) {
    %c0_i32 = arith.constant 0 : i32
    %c0_i32_0 = arith.constant 0 : i32
    return %arg0, %c0_i32 : i32, i32
  }
  func.func @transform_1(%arg0: i32) -> (i32, i32) {
    %c0_i32 = arith.constant 0 : i32
    %c0_i32_0 = arith.constant 0 : i32
    %c0_i32_1 = arith.constant 0 : i32
    return %c0_i32, %c0_i32_0 : i32, i32
  }
  func.func @transform_2(%arg0: i32) -> (i32, i32) {
    %c0_i32 = arith.constant 0 : i32
    %c0_i32_0 = arith.constant 0 : i32
    %c0_i32_1 = arith.constant 0 : i32
    return %c0_i32, %c0_i32_0 : i32, i32
  }
  func.func @transform_3(%arg0: i32) -> (i32, i32) {
    %c0_i32 = arith.constant 0 : i32
    %c0_i32_0 = arith.constant 0 : i32
    %c0_i32_1 = arith.constant 0 : i32
    return %c0_i32, %c0_i32_0 : i32, i32
  }
  func.func @transform_4(%arg0: i32) -> (i32, i32) {
    %c0_i32 = arith.constant 0 : i32
    %c0_i32_0 = arith.constant 0 : i32
    %c0_i32_1 = arith.constant 0 : i32
    return %c0_i32, %c0_i32_0 : i32, i32
  }
  func.func @transform_5(%arg0: i32) -> (i32, i32) {
    %c0_i32 = arith.constant 0 : i32
    %c0_i32_0 = arith.constant 0 : i32
    %c0_i32_1 = arith.constant 0 : i32
    return %c0_i32, %c0_i32_0 : i32, i32
  }
  func.func @transform_6(%arg0: i32) -> (i32, i32) {
    %c0_i32 = arith.constant 0 : i32
    %c0_i32_0 = arith.constant 0 : i32
    %c0_i32_1 = arith.constant 0 : i32
    return %c0_i32, %c0_i32_0 : i32, i32
  }
  func.func @transform_7(%arg0: i32) -> (i32, i32) {
    %c0_i32 = arith.constant 0 : i32
    %c0_i32_0 = arith.constant 0 : i32
    return %arg0, %c0_i32 : i32, i32
  }
}

</mosaic_0001>

<bundles_post_ra>
// kernel: tpu_custom_call.1
= control target key start
LH: loop header
LB: loop body
LE: loop exit
PB: predicated region body
PF: predicated region fallthrough
CT: control target
= control target key end

     0   :  { %12 = vsyncpa [#allocation3], 0  ;;  %s903_s0 = inlined_call_operand.hbm [shape: f32[8,128], index: 0, kind: input, shape index: {}]   ;;  %s904_s1 = inlined_call_operand.hbm [shape: f32[128,128], index: 1, kind: input, shape index: {}]   ;;  %s905_s2 = inlined_call_operand.vmem [shape: f32[1,128], index: 2, kind: input, shape index: {}]   ;;  %s906_s3 = inlined_call_operand.hbm [shape: f32[128,128], index: 3, kind: input, shape index: {}]   ;;  %s907_s4 = inlined_call_operand.vmem [shape: f32[1,128], index: 4, kind: input, shape index: {}]   ;;  %s908_s5 = inlined_call_operand.hbm [shape: f32[128,128], index: 5, kind: input, shape index: {}]   ;;  %s909_s6 = inlined_call_operand.vmem [shape: f32[1,128], index: 6, kind: input, shape index: {}]   ;;  %s910_s7 = inlined_call_operand.hbm [shape: f32[8,128], index: 7, kind: output, shape index: {}]  }
   0x1   :  { %13 = vsyncpa [#allocation6], 0 }
   0x2   :  { %14 = vsyncpa [#allocation9], 0 }
   0x3   :  { %15 = vsyncpa [#allocation4], 0  ;;  %s745_s24 = smov [#allocation5]   ;;  %s627_s28 = scalar_lea.hbm %s904_s1, 2048 }
   0x4   :  { %s31_s25 = sshll.u32 %s745_s24, 4  ;;  %p628_p0 = scmp.ne.s32.totalorder %s904_s1, %s627_s28  ;;  %s32_s25 = int_to_ptr.vmem [resolvable:$true] %s31_s25 }
   0x5   :  { %p631_p1 = scmp.lt.u32.totalorder %s627_s28, %s904_s1 }
   0x7   :  { %p633_p2 = pnand %p631_p1, %p628_p0 }
   0x9   :  { %636 = shalt.err (!%p633_p2)
}
   0xa   :  { %s637_s10 = scalar_lea.vmem %s32_s25, 2048  ;;  %p642_p4 = scmp.lt.s32.totalorder %s32_s25, %s32_s25 }
   0xb   :  { %p638_p3 = scmp.ne.s32.totalorder %s32_s25, %s637_s10  ;;  %p643_p5 = scmp.lt.s32.totalorder %s637_s10, %s637_s10 }
   0xd   :  { %p644_p6 = por %p643_p5, %p642_p4 }
   0xf   :  { %p645_p7 = pnand %p644_p6, %p638_p3 }
  0x11   :  { %648 = shalt.err (!%p645_p7)
}
  0x12   :  { %s746_s11 = smov 128   ;;  %s747_s12 = smov 8  }
  0x13   :  { %37 = dma.hbm_to_vmem [thread:$0]  %s904_s1, 2048, %s32_s25, [#allocation6], %s746_s11, %s746_s11, %s747_s12  }
  0x14   :  { %s748_s15 = smov [#allocation2]   ;;  %s749_s17 = smov [#allocation7]  }
  0x15   :  { %s22_s16 = sshll.u32 %s748_s15, 4  ;;  %s45_s18 = sshll.u32 %s749_s17, 4  ;;  %s23_s16 = int_to_ptr.vmem [resolvable:$true] %s22_s16  ;;  %s46_s18 = int_to_ptr.vmem [resolvable:$true] %s45_s18 }
  0x16   :  { %s649_s21 = scalar_lea.hbm %s903_s0, 128 }
  0x17   :  { %p650_p8 = scmp.ne.s32.totalorder %s903_s0, %s649_s21  ;;  %p653_p9 = scmp.lt.u32.totalorder %s649_s21, %s903_s0 }
  0x19   :  { %p655_p10 = pnand %p653_p9, %p650_p8 }
  0x1b   :  { %658 = shalt.err (!%p655_p10)
}
  0x1c   :  { %s659_s1 = scalar_lea.vmem %s23_s16, 128  ;;  %p664_p12 = scmp.lt.s32.totalorder %s23_s16, %s23_s16 }
  0x1d   :  { %p660_p11 = scmp.ne.s32.totalorder %s23_s16, %s659_s1  ;;  %p665_p13 = scmp.lt.s32.totalorder %s659_s1, %s659_s1 }
  0x1f   :  { %p666_p0 = por %p665_p13, %p664_p12 }
  0x21   :  { %p667_p1 = pnand %p666_p0, %p660_p11 }
  0x23   :  { %670 = shalt.err (!%p667_p1)
}
  0x24   :  { %25 = dma.hbm_to_vmem [thread:$0]  %s903_s0, 128, %s23_s16, [#allocation3]  }
  0x25   :  { %s671_s30 = scalar_lea.hbm %s906_s3, 2048 }
  0x26   :  { %p672_p2 = scmp.ne.s32.totalorder %s906_s3, %s671_s30  ;;  %p675_p3 = scmp.lt.u32.totalorder %s671_s30, %s906_s3 }
  0x28   :  { %p677_p4 = pnand %p675_p3, %p672_p2 }
  0x2a   :  { %680 = shalt.err (!%p677_p4)
}
  0x2b   :  { %s681_s14 = scalar_lea.vmem %s46_s18, 2048  ;;  %p686_p6 = scmp.lt.s32.totalorder %s46_s18, %s46_s18 }
  0x2c   :  { %p682_p5 = scmp.ne.s32.totalorder %s46_s18, %s681_s14  ;;  %p687_p7 = scmp.lt.s32.totalorder %s681_s14, %s681_s14 }
  0x2e   :  { %p688_p8 = por %p687_p7, %p686_p6 }
  0x30   :  { %p689_p9 = pnand %p688_p8, %p682_p5 }
  0x32   :  { %692 = shalt.err (!%p689_p9)
}
  0x33   :  { %51 = dma.hbm_to_vmem [thread:$0]  %s906_s3, 2048, %s46_s18, [#allocation6], %s746_s11, %s746_s11, %s747_s12  }
  0x34   :  { %s750_s16 = smov [#allocation8]   ;;  %s693_s21 = scalar_lea.hbm %s908_s5, 2048 }
  0x35   :  { %s59_s17 = sshll.u32 %s750_s16, 4  ;;  %p694_p10 = scmp.ne.s32.totalorder %s908_s5, %s693_s21  ;;  %s60_s17 = int_to_ptr.vmem [resolvable:$true] %s59_s17 }
  0x36   :  { %p697_p11 = scmp.lt.u32.totalorder %s693_s21, %s908_s5 }
  0x38   :  { %p699_p12 = pnand %p697_p11, %p694_p10 }
  0x3a   :  { %702 = shalt.err (!%p699_p12)
}
  0x3b   :  { %s703_s1 = scalar_lea.vmem %s60_s17, 2048  ;;  %p708_p0 = scmp.lt.s32.totalorder %s60_s17, %s60_s17 }
  0x3c   :  { %p704_p13 = scmp.ne.s32.totalorder %s60_s17, %s703_s1  ;;  %p709_p1 = scmp.lt.s32.totalorder %s703_s1, %s703_s1 }
  0x3e   :  { %p710_p2 = por %p709_p1, %p708_p0 }
  0x40   :  { %p711_p3 = pnand %p710_p2, %p704_p13 }
  0x42   :  { %714 = shalt.err (!%p711_p3)
}
  0x43   :  { %65 = dma.hbm_to_vmem [thread:$0]  %s908_s5, 2048, %s60_s17, [#allocation9], %s746_s11, %s746_s11, %s747_s12  }
  0x44   :  { %737 = dma.done.wait [#allocation3], 128  }
  0x45   :  { %738 = vsyncadd [#allocation3], 4294967168 }
  0x46   :  { %739 = dma.done.wait [#allocation6], 4096  }
  0x47   :  { %740 = vsyncadd [#allocation6], 4294963200 }
  0x48   :  { %741 = dma.done.wait [#allocation9], 2048  }
  0x49   :  { %742 = vsyncadd [#allocation9], 4294965248  ;;  %v751_v0 = vmov 0.0|0.0   ;;  %vm752_vm0 = vmmov 0   ;;  %v753_v1 = vmov 0.0   ;;  %v81_v2 = vld [vmem:[#allocation5] sm:$0xff] }
  0x4a   :  { %543 = vmatprep.subr.bf16.mxu0 %v751_v0  ;;  %470 = vmatprep.mubr.msk.f32.mxu0 %vm752_vm0, %v753_v1  ;;  %v82_v3 = vld [vmem:[#allocation5 + $0x8] sm:$0xff]  ;;  %v83_v4 = vld [vmem:[#allocation5 + $0x10] sm:$0xff]  ;;  %v84_v6 = vld [vmem:[#allocation5 + $0x18] sm:$0xff]  ;;  %s754_s28 = smov [#allocation10]  }
  0x4b   :  { %567 = vmatprep.subr.bf16.mxu1 %v751_v0  ;;  %505 = vmatprep.mubr.msk.f32.mxu1 %vm752_vm0, %v753_v1  ;;  %v544_v5 = vpack.c.bf16 %v82_v3, %v81_v2  ;;  %v547_v7 = vpack.c.bf16 %v84_v6, %v83_v4  ;;  %v85_v8 = vld [vmem:[#allocation5 + $0x20] sm:$0xff]  ;;  %v86_v9 = vld [vmem:[#allocation5 + $0x28] sm:$0xff]  ;;  %v177_v12 = vld [vmem:[#allocation7 + $0x10] sm:$0xff]  ;;  %s373_s29 = sshll.u32 %s754_s28, 4  ;;  %s374_s29 = int_to_ptr.vmem [resolvable:$true] %s373_s29 }
  0x4c   :  { %v175_v10 = vld [vmem:[#allocation7] sm:$0xff]  ;;  %v176_v11 = vld [vmem:[#allocation7 + $0x8] sm:$0xff]  ;;  %v178_v13 = vld [vmem:[#allocation7 + $0x18] sm:$0xff]  ;;  %v550_v14 = vpack.c.bf16 %v86_v9, %v85_v8  ;;  %p720_p5 = scmp.lt.s32.totalorder %s374_s29, %s374_s29 }
  0x4d   :  { %545 = vmatpush3.bf16.msra.mxu0 %v544_v5  ;;  %v568_v15 = vpack.c.bf16 %v176_v11, %v175_v10  ;;  %v87_v16 = vld [vmem:[#allocation5 + $0x30] sm:$0xff]  ;;  %v88_v17 = vld [vmem:[#allocation5 + $0x38] sm:$0xff]  ;;  %v571_v18 = vpack.c.bf16 %v178_v13, %v177_v12  ;;  %v179_v19 = vld [vmem:[#allocation7 + $0x20] sm:$0xff] }
  0x4e   :  { %546 = vmatprep.subr.bf16.mxu0 %v751_v0  ;;  %v180_v20 = vld [vmem:[#allocation7 + $0x28] sm:$0xff]  ;;  %v553_v21 = vpack.c.bf16 %v88_v17, %v87_v16  ;;  %v89_v22 = vld [vmem:[#allocation5 + $0x40] sm:$0xff]  ;;  %v181_v25 = vld [vmem:[#allocation7 + $0x30] sm:$0xff] }
  0x4f   :  { %569 = vmatpush3.bf16.msra.mxu1 %v568_v15  ;;  %v90_v23 = vld [vmem:[#allocation5 + $0x48] sm:$0xff]  ;;  %v574_v24 = vpack.c.bf16 %v180_v20, %v179_v19  ;;  %v182_v26 = vld [vmem:[#allocation7 + $0x38] sm:$0xff]  ;;  %v91_v28 = vld [vmem:[#allocation5 + $0x50] sm:$0xff] }
  0x50   :  { %570 = vmatprep.subr.bf16.mxu1 %v751_v0  ;;  %v556_v27 = vpack.c.bf16 %v90_v23, %v89_v22  ;;  %v92_v29 = vld [vmem:[#allocation5 + $0x58] sm:$0xff]  ;;  %v577_v30 = vpack.c.bf16 %v182_v26, %v181_v25  ;;  %v183_v31 = vld [vmem:[#allocation7 + $0x40] sm:$0xff]  ;;  %v184_v32 = vld [vmem:[#allocation7 + $0x48] sm:$0xff] }
  0x51   :  { %548 = vmatpush3.bf16.msra.mxu0 %v547_v7  ;;  %v559_v33 = vpack.c.bf16 %v92_v29, %v91_v28  ;;  %v93_v34 = vld [vmem:[#allocation5 + $0x60] sm:$0xff]  ;;  %v94_v35 = vld [vmem:[#allocation5 + $0x68] sm:$0xff]  ;;  %v580_v36 = vpack.c.bf16 %v184_v32, %v183_v31  ;;  %v185_v37 = vld [vmem:[#allocation7 + $0x50] sm:$0xff] }
  0x52   :  { %549 = vmatprep.subr.bf16.mxu0 %v751_v0  ;;  %v186_v38 = vld [vmem:[#allocation7 + $0x58] sm:$0xff]  ;;  %v562_v39 = vpack.c.bf16 %v94_v35, %v93_v34  ;;  %v95_v40 = vld [vmem:[#allocation5 + $0x70] sm:$0xff]  ;;  %v187_v43 = vld [vmem:[#allocation7 + $0x60] sm:$0xff] }
  0x53   :  { %572 = vmatpush3.bf16.msra.mxu1 %v571_v18  ;;  %v96_v41 = vld [vmem:[#allocation5 + $0x78] sm:$0xff]  ;;  %v583_v42 = vpack.c.bf16 %v186_v38, %v185_v37  ;;  %v188_v44 = vld [vmem:[#allocation7 + $0x68] sm:$0xff]  ;;  %v189_v48 = vld [vmem:[#allocation7 + $0x70] sm:$0xff] }
  0x54   :  { %573 = vmatprep.subr.bf16.mxu1 %v751_v0  ;;  %v565_v45 = vpack.c.bf16 %v96_v41, %v95_v40  ;;  %v586_v46 = vpack.c.bf16 %v188_v44, %v187_v43  ;;  %v80_v47 = vld [vmem:[#allocation2] sm:$0xff]  ;;  %v269_v51 = vld [vmem:[#allocation8] sm:$0xff]  ;;  %v270_v52 = vld [vmem:[#allocation8 + $0x8] sm:$0xff] }
  0x55   :  { %551 = vmatpush3.bf16.msra.mxu0 %v550_v14  ;;  %v190_v49 = vld [vmem:[#allocation7 + $0x78] sm:$0xff]  ;;  %v271_v53 = vld [vmem:[#allocation8 + $0x10] sm:$0xff]  ;;  %v592_v54 = vpack.c.bf16 %v270_v52, %v269_v51  ;;  %v273_v57 = vld [vmem:[#allocation8 + $0x20] sm:$0xff] }
  0x56   :  { %552 = vmatprep.subr.bf16.mxu0 %v751_v0  ;;  %v589_v50 = vpack.c.bf16 %v190_v49, %v189_v48  ;;  %v272_v55 = vld [vmem:[#allocation8 + $0x18] sm:$0xff]  ;;  %v274_v58 = vld [vmem:[#allocation8 + $0x28] sm:$0xff]  ;;  %v275_v60 = vld [vmem:[#allocation8 + $0x30] sm:$0xff] }
  0x57   :  { %575 = vmatpush3.bf16.msra.mxu1 %v574_v24  ;;  %v595_v56 = vpack.c.bf16 %v272_v55, %v271_v53  ;;  %v598_v59 = vpack.c.bf16 %v274_v58, %v273_v57  ;;  %v276_v61 = vld [vmem:[#allocation8 + $0x38] sm:$0xff]  ;;  %v277_v63 = vld [vmem:[#allocation8 + $0x40] sm:$0xff]  ;;  %v279_v3 = vld [vmem:[#allocation8 + $0x50] sm:$0xff] }
  0x58   :  { %576 = vmatprep.subr.bf16.mxu1 %v751_v0  ;;  %v601_v62 = vpack.c.bf16 %v276_v61, %v275_v60  ;;  %v280_v4 = vld [vmem:[#allocation8 + $0x58] sm:$0xff]  ;;  %v281_v6 = vld [vmem:[#allocation8 + $0x60] sm:$0xff]  ;;  %v282_v7 = vld [vmem:[#allocation8 + $0x68] sm:$0xff] }
  0x59   :  { %554 = vmatpush3.bf16.msra.mxu0 %v553_v21  ;;  %v607_v5 = vpack.c.bf16 %v280_v4, %v279_v3  ;;  %v610_v8 = vpack.c.bf16 %v282_v7, %v281_v6  ;;  %v384_v9 = vld [vmem:[%s905_s2] ss:$0 sm:$0xff]  ;;  %v283_v14 = vld [vmem:[#allocation8 + $0x70] sm:$0xff] }
  0x5a   :  { %555 = vmatprep.subr.bf16.mxu0 %v751_v0  ;;  %v284_v15 = vld [vmem:[#allocation8 + $0x78] sm:$0xff] }
  0x5b   :  { %578 = vmatpush3.bf16.msra.mxu1 %v577_v30  ;;  %v613_v16 = vpack.c.bf16 %v284_v15, %v283_v14  ;;  %v385_v17 = vld [vmem:[%s907_s4] ss:$0 sm:$0xff]  ;;  %s715_s4 = scalar_lea.vmem %s374_s29, 128 }
  0x5c   :  { %579 = vmatprep.subr.bf16.mxu1 %v751_v0  ;;  %v386_v21 = vld [vmem:[%s909_s6] ss:$0 sm:$0xff]  ;;  %p716_p4 = scmp.ne.s32.totalorder %s374_s29, %s715_s4  ;;  %p721_p6 = scmp.lt.s32.totalorder %s715_s4, %s715_s4 }
  0x5d   :  { %557 = vmatpush3.bf16.msra.mxu0 %v556_v27 }
  0x5e   :  { %558 = vmatprep.subr.bf16.mxu0 %v751_v0  ;;  %p722_p7 = por %p721_p6, %p720_p5 }
  0x5f   :  { %581 = vmatpush3.bf16.msra.mxu1 %v580_v36 }
  0x60   :  { %582 = vmatprep.subr.bf16.mxu1 %v751_v0  ;;  %p723_p8 = pnand %p722_p7, %p716_p4 }
  0x61   :  { %560 = vmatpush3.bf16.msra.mxu0 %v559_v33 }
  0x62   :  { %561 = vmatprep.subr.bf16.mxu0 %v751_v0 }
  0x63   :  { %584 = vmatpush3.bf16.msra.mxu1 %v583_v42 }
  0x64   :  { %585 = vmatprep.subr.bf16.mxu1 %v751_v0 }
  0x65   :  { %563 = vmatpush3.bf16.msra.mxu0 %v562_v39 }
  0x66   :  { %564 = vmatprep.subr.bf16.mxu0 %v751_v0 }
  0x67   :  { %587 = vmatpush3.bf16.msra.mxu1 %v586_v46 }
  0x68   :  { %588 = vmatprep.subr.bf16.mxu1 %v751_v0 }
  0x69   :  { %566 = vmatpush3.bf16.msra.mxu0 %v565_v45 }
  0x6a   :  { %591 = vmatprep.subr.bf16.mxu0 %v751_v0 }
  0x6b   :  { %590 = vmatpush3.bf16.msra.mxu1 %v589_v50 }
  0x6c   :  { %471 = vmatmul.mubr.f32.vlgmr.msra.gmra.mrb[0].mxu0 %v80_v47 }
  0x6d   :  { %540 = vmatprep.mubr.msk.f32.mxu0 %vm752_vm0, %v753_v1  ;;  %593 = vmatpush3.bf16.msra.mxu0 %v592_v54  ;;  %v278_v1 = vld [vmem:[#allocation8 + $0x48] sm:$0xff] }
  0x6e   :  { %594 = vmatprep.subr.bf16.mxu0 %v751_v0  ;;  %v604_v2 = vpack.c.bf16 %v278_v1, %v277_v63 }
  0x71   :  { %596 = vmatpush3.bf16.msra.mxu0 %v595_v56 }
  0x72   :  { %597 = vmatprep.subr.bf16.mxu0 %v751_v0 }
  0x75   :  { %599 = vmatpush3.bf16.msra.mxu0 %v598_v59 }
  0x76   :  { %600 = vmatprep.subr.bf16.mxu0 %v751_v0 }
  0x79   :  { %602 = vmatpush3.bf16.msra.mxu0 %v601_v62 }
  0x7a   :  { %603 = vmatprep.subr.bf16.mxu0 %v751_v0 }
  0x7d   :  { %605 = vmatpush3.bf16.msra.mxu0 %v604_v2 }
  0x7e   :  { %606 = vmatprep.subr.bf16.mxu0 %v751_v0 }
  0x81   :  { %608 = vmatpush3.bf16.msra.mxu0 %v607_v5 }
  0x82   :  { %609 = vmatprep.subr.bf16.mxu0 %v751_v0 }
  0x85   :  { %611 = vmatpush3.bf16.msra.mxu0 %v610_v8 }
  0x86   :  { %612 = vmatprep.subr.bf16.mxu0 %v751_v0 }
  0x89   :  { %614 = vmatpush3.bf16.msra.mxu0 %v613_v16 }
 0x13f   :  { %v170_v10 = vpop.f32.mrb[0].mxu0 }
 0x140   :  { %v171_v11 = vadd.f32 %v384_v9, %v170_v10  ;;  %v472_v12 = vpop.f32.mrb[1].mxu0 }
 0x142   :  { %v174_v13 = vmax.f32 %v171_v11, 0.0 }
 0x144   :  { %506 = vmatmul.mubr.f32.vlgmr.msra.gmra.mrb[0].mxu1 %v174_v13 }
 0x217   :  { %v264_v18 = vpop.f32.mrb[0].mxu1 }
 0x218   :  { %v265_v19 = vadd.f32 %v385_v17, %v264_v18  ;;  %v507_v0 = vpop.f32.mrb[1].mxu1 }
 0x21a   :  { %v268_v20 = vmax.f32 %v265_v19, 0.0 }
 0x21c   :  { %541 = vmatmul.mubr.f32.vlgmr.msra.gmra.mrb[2].mxu0 %v268_v20 }
 0x2ef   :  { %v358_v22 = vpop.f32.mrb[2].mxu0 }
 0x2f0   :  { %v359_v23 = vadd.f32 %v386_v21, %v358_v22  ;;  %v542_v24 = vpop.f32.mrb[3].mxu0 }
 0x2f2   :  { %v362_v25 = vmul.f32 0.5, %v359_v23 }
 0x2f4   :  { %625 = vtanh.f32 %v362_v25 }
 0x2fe   :  { %v626_v26 = vpop.eup %625 }
 0x2ff   :  { %v364_v27 = vadd.f32 1.0, %v626_v26 }
 0x301   :  { %v365_v28 = vmul.f32 0.5, %v364_v27 }
 0x303   :  { %366 = vst [vmem:[#allocation10] sm:$0xff] %v365_v28 }
 0x304   :  { %726 = shalt.err (!%p723_p8)
}
 0x305   :  { %s727_s8 = scalar_lea.hbm %s910_s7, 128 }
 0x306   :  { %p728_p9 = scmp.ne.s32.totalorder %s910_s7, %s727_s8  ;;  %p731_p10 = scmp.lt.u32.totalorder %s727_s8, %s910_s7 }
 0x308   :  { %p733_p11 = pnand %p731_p10, %p728_p9 }
 0x30a   :  { %736 = shalt.err (!%p733_p11)
}
 0x30b   :  { %376 = dma.vmem_to_hbm [thread:$0]  %s374_s29, 128, %s910_s7, [#allocation4]  }
 0x30c   :  { %743 = dma.done.wait [#allocation4], 128  }
 0x30d   :  { %744 = vsyncadd [#allocation4], 4294967168 }
 0x30e   :  { %380 = vsyncpa [#allocation3], 1 }
 0x30f   :  { %381 = vsyncpa [#allocation6], 1 }
 0x310   :  { %382 = vsyncpa [#allocation9], 1 }
 0x311   :  { %383 = vsyncpa [#allocation4], 1 }

</bundles_post_ra>
